<compile_context>
chip_gen: v5e
topology: v5e:2x2
jax: 0.10.0
libtpu: 0.0.40
codegen_flags: <defaults>
</compile_context>

<pallas_src>
import functools
import math

import jax
import jax.numpy as jnp
from jax.experimental import pallas as pl
from jax.experimental.pallas import tpu as pltpu


# ----------------------------------------------------------------------------
# Fused Pallas kernel: the whole KAN stack for one batch tile.
# Ref order: x_ref, [tilemat, table, w_packed] * num_layers, out_ref
# ----------------------------------------------------------------------------
def kan_stack_kernel(*refs, num_layers, spline_order, mxu_dtype):
    x_ref = refs[0]
    out_ref = refs[-1]
    layer_refs = refs[1:-1]

    x = x_ref[...].astype(jnp.float32)            # (TB, IN0)

    for l in range(num_layers):
        tile_ref, tab_ref, w_ref = layer_refs[3 * l: 3 * l + 3]
        in_f, l0 = tile_ref.shape                 # l0 = (G-1) * IN
        gm1 = l0 // in_f                          # G - 1

        tab = tab_ref[...]                        # (2 + 3*S, L0) parameter table
        glo = tab[0:1, :]                         # grid[i, j]   at slot j*IN+i
        gup = tab[1:2, :]                         # grid[i, j+1]

        # Replicate x across the (G-1) basis slots via a 0/1 matmul -> lane
        # dense.  Stays in f32: the knot-interval comparisons below are
        # precision sensitive.
        xb = jnp.dot(x, tile_ref[...],
                     preferred_element_type=jnp.float32)          # (TB, L0)

        # Order-0 bases: indicator of the knot interval containing x.
        bases = jnp.logical_and(xb >= glo, xb < gup).astype(jnp.float32)

        # Cox-de Boor recursion, vectorized over all (basis slot, feature)
        # pairs; width shrinks by IN lanes per order.  All f32 on the VPU.
        for k in range(1, spline_order + 1):
            lk = (gm1 - k) * in_f
            r = 2 + 3 * (k - 1)
            rl = tab[r + 0:r + 1, :lk]            # 1/(g[j+k]   - g[j])
            rr = tab[r + 1:r + 2, :lk]            # 1/(g[j+k+1] - g[j+1])
            ghi = tab[r + 2:r + 3, :lk]           # g[j+k+1]
            xk = xb[:, :lk]
            left = (xk - glo[:, :lk]) * rl * bases[:, :lk]
            right = (ghi - xk) * rr * bases[:, in_f:in_f + lk]
            bases = left + right                  # (TB, (G-1-k)*IN)

        # Fused matmul: RHS = [bases | silu(x)] against W = [spline_w ; base_w]
        # -> ONE MXU issue per layer.  bases width = COEF*IN (multiple of 128),
        # so the concat is lane-aligned.  Operands optionally bf16, f32 acc.
        silu_x = x * jax.nn.sigmoid(x)            # (TB, IN)
        rhs = jnp.concatenate([bases, silu_x], axis=-1).astype(mxu_dtype)
        x = jnp.dot(rhs, w_ref[...],
                    preferred_element_type=jnp.float32)           # (TB, OUTp)

    out_ref[...] = x.astype(out_ref.dtype)


# ----------------------------------------------------------------------------
# Wrapper-side parameter preparation (plain JAX, runs once outside the kernel)
# ----------------------------------------------------------------------------
def _round_up(n, m):
    return ((n + m - 1) // m) * m


def _prep_layer(p, grid_size, spline_order, out_pad, mxu_dtype):
    grid = p["grid"].astype(jnp.float32)          # (IN, G)
    in_f, g_len = grid.shape
    coef = grid_size + spline_order
    l0 = (g_len - 1) * in_f

    def flat(a):
        # (IN, W) -> (1, W*IN) in basis-slot-major order, zero-padded to L0.
        w = a.shape[1]
        f = a.T.reshape(1, w * in_f)
        return jnp.pad(f, ((0, 0), (0, l0 - w * in_f)))

    rows = [flat(grid[:, :-1]), flat(grid[:, 1:])]
    for k in range(1, spline_order + 1):
        dl = grid[:, k:-1] - grid[:, :-(k + 1)]
        dr = grid[:, k + 1:] - grid[:, 1:-k]
        rl = jnp.where(dl == 0, 0.0, 1.0 / dl)    # guard degenerate knots
        rr = jnp.where(dr == 0, 0.0, 1.0 / dr)
        rows += [flat(rl), flat(rr), flat(grid[:, k + 1:])]
    table = jnp.concatenate(rows, axis=0)         # (2 + 3*S, L0), f32

    # 0/1 replication matrix: xb[b, j*IN+i] = x[b, i]  (kept f32 for exactness)
    tilemat = jnp.tile(jnp.eye(in_f, dtype=jnp.float32), (1, g_len - 1))  # (IN, L0)

    # Packed weight for the fused matmul: rows = [spline (slot-major) ; base].
    scaled = p["spline_weight"] * p["spline_scaler"][:, :, None]   # (OUT, IN, COEF)
    spline_w = jnp.transpose(scaled, (2, 1, 0)).reshape(coef * in_f, -1)  # (COEF*IN, OUT)
    base_w = p["base_weight"].T                                           # (IN, OUT)
    w = jnp.concatenate([spline_w, base_w], axis=0)      # (COEF*IN + IN, OUT)
    out_f = w.shape[1]
    if out_pad > out_f:
        # Zero-pad OUT (last layer only) -> lane-dense output stores.
        w = jnp.pad(w, ((0, 0), (0, out_pad - out_f)))
    return tilemat, table, w.astype(mxu_dtype)


def kan_forward(params, x, *, grid_size=5, spline_order=3,
                block_batch=256, mxu_dtype=jnp.float32):
    """Full KAN forward (all layers) in a single batch-tiled pallas_call.

    block_batch: batch tile (sweep 128-512 for large batches).  On v7x pick it
    so num_blocks is even (2 TensorCores share the 'parallel' grid axis).
    mxu_dtype: operand dtype for the fused per-layer matmul (f32 accumulate).
    Use jnp.bfloat16 on v6e/v7x for native-MXU throughput.
    """
    batch, in0 = x.shape
    out_features = params[-1]["base_weight"].shape[0]
    out_pad = _round_up(out_features, 128)        # lane-dense output store

    # Batch tiling: collapse tiny batches to a single grid step; otherwise use
    # large tiles so the MXU sees many rows per pass and grid-step overhead
    # (~0.35us) amortizes.
    if batch <= block_batch:
        tb = _round_up(batch, 8)
        num_blocks = 1
    else:
        tb = _round_up(block_batch, 8)
        num_blocks = pl.cdiv(batch, tb)
    padded_b = num_blocks * tb
    if padded_b != batch:
        x = jnp.pad(x, ((0, padded_b - batch), (0, 0)))

    flat_inputs = [x]
    in_specs = [pl.BlockSpec((tb, in0), lambda b: (b, 0))]
    for li, p in enumerate(params):
        layer_out_pad = out_pad if li == len(params) - 1 else p["base_weight"].shape[0]
        for a in _prep_layer(p, grid_size, spline_order, layer_out_pad, mxu_dtype):
            flat_inputs.append(a)
            # Parameters are resident full blocks (constant index map).
            in_specs.append(pl.BlockSpec(a.shape, lambda b: (0, 0)))

    kernel = functools.partial(kan_stack_kernel,
                               num_layers=len(params),
                               spline_order=spline_order,
                               mxu_dtype=mxu_dtype)

    out = pl.pallas_call(
        kernel,
        out_shape=jax.ShapeDtypeStruct((padded_b, out_pad), jnp.float32),
        grid=(num_blocks,),
        in_specs=in_specs,
        out_specs=pl.BlockSpec((tb, out_pad), lambda b: (b, 0)),
        compiler_params=pltpu.CompilerParams(
            dimension_semantics=("parallel",),
            vmem_limit_bytes=32 * 1024 * 1024),
    )(*flat_inputs)
    return out[:batch, :out_features]


# ----------------------------------------------------------------------------
# Deterministic synthetic parameters (shapes match KANLinear.__init__)
# ----------------------------------------------------------------------------
def make_kan_params(key, layers_hidden, *, grid_size=5, spline_order=3,
                    grid_range=(-1.0, 1.0)):
    params = []
    h = (grid_range[1] - grid_range[0]) / grid_size
    g1d = (jnp.arange(-spline_order, grid_size + spline_order + 1,
                      dtype=jnp.float32) * h + grid_range[0])      # (G,)
    coef = grid_size + spline_order
    for in_f, out_f in zip(layers_hidden, layers_hidden[1:]):
        key, k1, k2, k3 = jax.random.split(key, 4)
        grid = jnp.broadcast_to(g1d, (in_f, g1d.shape[0]))         # (IN, G)
        bound = 1.0 / math.sqrt(in_f)
        base_weight = jax.random.uniform(k1, (out_f, in_f),
                                         minval=-bound, maxval=bound,
                                         dtype=jnp.float32)
        spline_weight = 0.1 * jax.random.normal(k2, (out_f, in_f, coef),
                                                dtype=jnp.float32)
        spline_scaler = jax.random.uniform(k3, (out_f, in_f),
                                           minval=-bound, maxval=bound,
                                           dtype=jnp.float32)
        params.append(dict(grid=grid, base_weight=base_weight,
                           spline_weight=spline_weight,
                           spline_scaler=spline_scaler))
    return params


# ----------------------------------------------------------------------------
# Pure-JAX reference (mirrors the PyTorch forward) for the correctness check
# ----------------------------------------------------------------------------
def _b_splines_ref(x, grid, spline_order):
    xe = x[:, :, None]
    g = grid[None, :, :]
    bases = jnp.logical_and(xe >= g[:, :, :-1],
                            xe < g[:, :, 1:]).astype(x.dtype)
    for k in range(1, spline_order + 1):
        left = (xe - g[:, :, :-(k + 1)]) / (g[:, :, k:-1] - g[:, :, :-(k + 1)])
        right = (g[:, :, k + 1:] - xe) / (g[:, :, k + 1:] - g[:, :, 1:-k])
        bases = left * bases[:, :, :-1] + right * bases[:, :, 1:]
    return bases


def kan_forward_ref(params, x, *, spline_order=3):
    prec = jax.lax.Precision.HIGHEST
    for p in params:
        base_out = jnp.dot(jax.nn.silu(x), p["base_weight"].T, precision=prec)
        bases = _b_splines_ref(x, p["grid"], spline_order)
        scaled = p["spline_weight"] * p["spline_scaler"][:, :, None]
        spline_out = jnp.dot(bases.reshape(x.shape[0], -1),
                             scaled.reshape(scaled.shape[0], -1).T,
                             precision=prec)
        x = base_out + spline_out
    return x


# ----------------------------------------------------------------------------
if __name__ == "__main__":
    grid_size = 5
    spline_order = 3
    layers_hidden = [16, 32, 8]     # KAN([16, 32, 8])

    key = jax.random.PRNGKey(0)
    kx, kx2, kp = jax.random.split(key, 3)
    params = make_kan_params(kp, layers_hidden,
                             grid_size=grid_size, spline_order=spline_order)

    # --- small-batch path: whole batch in a single grid step (grid=(1,)) ----
    batch = 16
    x = jax.random.uniform(kx, (batch, layers_hidden[0]),
                           minval=-1.0, maxval=1.0, dtype=jnp.float32)
    out = jax.block_until_ready(
        kan_forward(params, x, grid_size=grid_size, spline_order=spline_order))
    ref = jax.block_until_ready(
        kan_forward_ref(params, x, spline_order=spline_order))
    assert out.shape == (batch, layers_hidden[-1])
    assert jnp.allclose(out, ref, rtol=1e-4, atol=1e-4), (
        f"max abs err {jnp.max(jnp.abs(out - ref))}")

    # --- multi-block path: batch tiled across the 'parallel' grid axis ------
    batch2 = 48
    x2 = jax.random.uniform(kx2, (batch2, layers_hidden[0]),
                            minval=-1.0, maxval=1.0, dtype=jnp.float32)
    out2 = jax.block_until_ready(
        kan_forward(params, x2, grid_size=grid_size, spline_order=spline_order,
                    block_batch=16))
    ref2 = jax.block_until_ready(
        kan_forward_ref(params, x2, spline_order=spline_order))
    assert out2.shape == (batch2, layers_hidden[-1])
    assert jnp.allclose(out2, ref2, rtol=1e-4, atol=1e-4), (
        f"max abs err {jnp.max(jnp.abs(out2 - ref2))}")

    # --- bf16 MXU-operand path (v6e/v7x recommendation), sanity tolerance ---
    out_bf16 = jax.block_until_ready(
        kan_forward(params, x, grid_size=grid_size, spline_order=spline_order,
                    mxu_dtype=jnp.bfloat16))
    assert out_bf16.shape == (batch, layers_hidden[-1])
    assert bool(jnp.all(jnp.isfinite(out_bf16)))
    assert jnp.allclose(out_bf16, ref, rtol=1e-1, atol=1e-1), (
        f"bf16 max abs err {jnp.max(jnp.abs(out_bf16 - ref))}")

    print("KERNEL_OK")
</pallas_src>

<mosaic_0001>
module attributes {stable_mosaic.version = 11 : i64} {
  func.func @kan_stack_kernel(%arg0: i32, %arg1: memref<16x16xf32, #tpu.memory_space<vmem>>, %arg2: memref<16x176xf32, #tpu.memory_space<vmem>>, %arg3: memref<11x176xf32, #tpu.memory_space<vmem>>, %arg4: memref<144x32xf32, #tpu.memory_space<vmem>>, %arg5: memref<32x352xf32, #tpu.memory_space<vmem>>, %arg6: memref<11x352xf32, #tpu.memory_space<vmem>>, %arg7: memref<288x128xf32, #tpu.memory_space<vmem>>, %arg8: memref<16x128xf32, #tpu.memory_space<vmem>>) attributes {dimension_semantics = [#tpu.dimension_semantics<parallel>], iteration_bounds = array<i64: 1>, scalar_prefetch = 0 : i64, scratch_operands = 0 : i64, tpu.core_type = #tpu.core_type<tc>, window_params = [{transform_indices = @transform_0, window_bounds = array<i64: 16, 16>}, {pipeline_mode = #tpu.pipeline_mode<synchronous>, transform_indices = @transform_1, window_bounds = array<i64: 16, 176>}, {pipeline_mode = #tpu.pipeline_mode<synchronous>, transform_indices = @transform_2, window_bounds = array<i64: 11, 176>}, {pipeline_mode = #tpu.pipeline_mode<synchronous>, transform_indices = @transform_3, window_bounds = array<i64: 144, 32>}, {pipeline_mode = #tpu.pipeline_mode<synchronous>, transform_indices = @transform_4, window_bounds = array<i64: 32, 352>}, {pipeline_mode = #tpu.pipeline_mode<synchronous>, transform_indices = @transform_5, window_bounds = array<i64: 11, 352>}, {pipeline_mode = #tpu.pipeline_mode<synchronous>, transform_indices = @transform_6, window_bounds = array<i64: 288, 128>}, {transform_indices = @transform_7, window_bounds = array<i64: 16, 128>}]} {
    %c0 = arith.constant 0 : index
    %c0_0 = arith.constant 0 : index
    %0 = vector.load %arg1[%c0, %c0_0] : memref<16x16xf32, #tpu.memory_space<vmem>>, vector<16x16xf32>
    %c0_1 = arith.constant 0 : index
    %c0_2 = arith.constant 0 : index
    %1 = vector.load %arg3[%c0_1, %c0_2] : memref<11x176xf32, #tpu.memory_space<vmem>>, vector<11x176xf32>
    %2 = vector.extract_strided_slice %1 {offsets = [0, 0], sizes = [1, 176], strides = [1, 1]} : vector<11x176xf32> to vector<1x176xf32>
    %3 = vector.extract_strided_slice %1 {offsets = [1, 0], sizes = [1, 176], strides = [1, 1]} : vector<11x176xf32> to vector<1x176xf32>
    %c0_3 = arith.constant 0 : index
    %c0_4 = arith.constant 0 : index
    %4 = vector.load %arg2[%c0_3, %c0_4] : memref<16x176xf32, #tpu.memory_space<vmem>>, vector<16x176xf32>
    %cst = arith.constant dense<0.000000e+00> : vector<16x176xf32>
    %5 = tpu.matmul %0, %4, %cst {dimension_numbers = #tpu.dot_dimension_numbers<[1], [0], [0], [1], [0, 0, 1, 1], [], []>} : vector<16x16xf32>, vector<16x176xf32>, vector<16x176xf32> -> vector<16x176xf32>
    %6 = vector.broadcast %2 : vector<1x176xf32> to vector<16x176xf32>
    %7 = arith.cmpf oge, %5, %6 : vector<16x176xf32>
    %8 = vector.broadcast %3 : vector<1x176xf32> to vector<16x176xf32>
    %9 = arith.cmpf olt, %5, %8 : vector<16x176xf32>
    %10 = arith.andi %7, %9 : vector<16x176xi1>
    %11 = arith.extui %10 : vector<16x176xi1> to vector<16x176xi32>
    %12 = arith.sitofp %11 : vector<16x176xi32> to vector<16x176xf32>
    %13 = vector.extract_strided_slice %1 {offsets = [2, 0], sizes = [1, 160], strides = [1, 1]} : vector<11x176xf32> to vector<1x160xf32>
    %14 = vector.extract_strided_slice %1 {offsets = [3, 0], sizes = [1, 160], strides = [1, 1]} : vector<11x176xf32> to vector<1x160xf32>
    %15 = vector.extract_strided_slice %1 {offsets = [4, 0], sizes = [1, 160], strides = [1, 1]} : vector<11x176xf32> to vector<1x160xf32>
    %16 = vector.extract_strided_slice %5 {offsets = [0, 0], sizes = [16, 160], strides = [1, 1]} : vector<16x176xf32> to vector<16x160xf32>
    %17 = vector.extract_strided_slice %2 {offsets = [0, 0], sizes = [1, 160], strides = [1, 1]} : vector<1x176xf32> to vector<1x160xf32>
    %18 = vector.broadcast %17 : vector<1x160xf32> to vector<16x160xf32>
    %19 = arith.subf %16, %18 : vector<16x160xf32>
    %20 = vector.broadcast %13 : vector<1x160xf32> to vector<16x160xf32>
    %21 = arith.mulf %19, %20 : vector<16x160xf32>
    %22 = vector.extract_strided_slice %12 {offsets = [0, 0], sizes = [16, 160], strides = [1, 1]} : vector<16x176xf32> to vector<16x160xf32>
    %23 = arith.mulf %21, %22 : vector<16x160xf32>
    %24 = vector.broadcast %15 : vector<1x160xf32> to vector<16x160xf32>
    %25 = arith.subf %24, %16 : vector<16x160xf32>
    %26 = vector.broadcast %14 : vector<1x160xf32> to vector<16x160xf32>
    %27 = arith.mulf %25, %26 : vector<16x160xf32>
    %28 = vector.extract_strided_slice %12 {offsets = [0, 16], sizes = [16, 160], strides = [1, 1]} : vector<16x176xf32> to vector<16x160xf32>
    %29 = arith.mulf %27, %28 : vector<16x160xf32>
    %30 = arith.addf %23, %29 : vector<16x160xf32>
    %31 = vector.extract_strided_slice %1 {offsets = [5, 0], sizes = [1, 144], strides = [1, 1]} : vector<11x176xf32> to vector<1x144xf32>
    %32 = vector.extract_strided_slice %1 {offsets = [6, 0], sizes = [1, 144], strides = [1, 1]} : vector<11x176xf32> to vector<1x144xf32>
    %33 = vector.extract_strided_slice %1 {offsets = [7, 0], sizes = [1, 144], strides = [1, 1]} : vector<11x176xf32> to vector<1x144xf32>
    %34 = vector.extract_strided_slice %5 {offsets = [0, 0], sizes = [16, 144], strides = [1, 1]} : vector<16x176xf32> to vector<16x144xf32>
    %35 = vector.extract_strided_slice %2 {offsets = [0, 0], sizes = [1, 144], strides = [1, 1]} : vector<1x176xf32> to vector<1x144xf32>
    %36 = vector.broadcast %35 : vector<1x144xf32> to vector<16x144xf32>
    %37 = arith.subf %34, %36 : vector<16x144xf32>
    %38 = vector.broadcast %31 : vector<1x144xf32> to vector<16x144xf32>
    %39 = arith.mulf %37, %38 : vector<16x144xf32>
    %40 = vector.extract_strided_slice %30 {offsets = [0, 0], sizes = [16, 144], strides = [1, 1]} : vector<16x160xf32> to vector<16x144xf32>
    %41 = arith.mulf %39, %40 : vector<16x144xf32>
    %42 = vector.broadcast %33 : vector<1x144xf32> to vector<16x144xf32>
    %43 = arith.subf %42, %34 : vector<16x144xf32>
    %44 = vector.broadcast %32 : vector<1x144xf32> to vector<16x144xf32>
    %45 = arith.mulf %43, %44 : vector<16x144xf32>
    %46 = vector.extract_strided_slice %30 {offsets = [0, 16], sizes = [16, 144], strides = [1, 1]} : vector<16x160xf32> to vector<16x144xf32>
    %47 = arith.mulf %45, %46 : vector<16x144xf32>
    %48 = arith.addf %41, %47 : vector<16x144xf32>
    %49 = vector.extract_strided_slice %1 {offsets = [8, 0], sizes = [1, 128], strides = [1, 1]} : vector<11x176xf32> to vector<1x128xf32>
    %50 = vector.extract_strided_slice %1 {offsets = [9, 0], sizes = [1, 128], strides = [1, 1]} : vector<11x176xf32> to vector<1x128xf32>
    %51 = vector.extract_strided_slice %1 {offsets = [10, 0], sizes = [1, 128], strides = [1, 1]} : vector<11x176xf32> to vector<1x128xf32>
    %52 = vector.extract_strided_slice %5 {offsets = [0, 0], sizes = [16, 128], strides = [1, 1]} : vector<16x176xf32> to vector<16x128xf32>
    %53 = vector.extract_strided_slice %2 {offsets = [0, 0], sizes = [1, 128], strides = [1, 1]} : vector<1x176xf32> to vector<1x128xf32>
    %54 = vector.broadcast %53 : vector<1x128xf32> to vector<16x128xf32>
    %55 = arith.subf %52, %54 : vector<16x128xf32>
    %56 = vector.broadcast %49 : vector<1x128xf32> to vector<16x128xf32>
    %57 = arith.mulf %55, %56 : vector<16x128xf32>
    %58 = vector.extract_strided_slice %48 {offsets = [0, 0], sizes = [16, 128], strides = [1, 1]} : vector<16x144xf32> to vector<16x128xf32>
    %59 = arith.mulf %57, %58 : vector<16x128xf32>
    %60 = vector.broadcast %51 : vector<1x128xf32> to vector<16x128xf32>
    %61 = arith.subf %60, %52 : vector<16x128xf32>
    %62 = vector.broadcast %50 : vector<1x128xf32> to vector<16x128xf32>
    %63 = arith.mulf %61, %62 : vector<16x128xf32>
    %64 = vector.extract_strided_slice %48 {offsets = [0, 16], sizes = [16, 128], strides = [1, 1]} : vector<16x144xf32> to vector<16x128xf32>
    %65 = arith.mulf %63, %64 : vector<16x128xf32>
    %66 = arith.addf %59, %65 : vector<16x128xf32>
    %67 = arith.negf %0 : vector<16x16xf32>
    %68 = math.exp %67 : vector<16x16xf32>
    %cst_5 = arith.constant 1.000000e+00 : f32
    %69 = vector.broadcast %cst_5 : f32 to vector<16x16xf32>
    %70 = arith.addf %69, %68 : vector<16x16xf32>
    %71 = arith.divf %69, %70 : vector<16x16xf32>
    %72 = arith.mulf %0, %71 : vector<16x16xf32>
    %73 = tpu.concatenate %66, %72 in 1 : vector<16x128xf32>, vector<16x16xf32> -> vector<16x144xf32>
    %c0_6 = arith.constant 0 : index
    %c0_7 = arith.constant 0 : index
    %74 = vector.load %arg4[%c0_6, %c0_7] : memref<144x32xf32, #tpu.memory_space<vmem>>, vector<144x32xf32>
    %cst_8 = arith.constant dense<0.000000e+00> : vector<16x32xf32>
    %75 = tpu.matmul %73, %74, %cst_8 {dimension_numbers = #tpu.dot_dimension_numbers<[1], [0], [0], [1], [0, 0, 1, 1], [], []>} : vector<16x144xf32>, vector<144x32xf32>, vector<16x32xf32> -> vector<16x32xf32>
    %c0_9 = arith.constant 0 : index
    %c0_10 = arith.constant 0 : index
    %76 = vector.load %arg6[%c0_9, %c0_10] : memref<11x352xf32, #tpu.memory_space<vmem>>, vector<11x352xf32>
    %77 = vector.extract_strided_slice %76 {offsets = [0, 0], sizes = [1, 352], strides = [1, 1]} : vector<11x352xf32> to vector<1x352xf32>
    %78 = vector.extract_strided_slice %76 {offsets = [1, 0], sizes = [1, 352], strides = [1, 1]} : vector<11x352xf32> to vector<1x352xf32>
    %c0_11 = arith.constant 0 : index
    %c0_12 = arith.constant 0 : index
    %79 = vector.load %arg5[%c0_11, %c0_12] : memref<32x352xf32, #tpu.memory_space<vmem>>, vector<32x352xf32>
    %cst_13 = arith.constant dense<0.000000e+00> : vector<16x352xf32>
    %80 = tpu.matmul %75, %79, %cst_13 {dimension_numbers = #tpu.dot_dimension_numbers<[1], [0], [0], [1], [0, 0, 1, 1], [], []>} : vector<16x32xf32>, vector<32x352xf32>, vector<16x352xf32> -> vector<16x352xf32>
    %81 = vector.broadcast %77 : vector<1x352xf32> to vector<16x352xf32>
    %82 = arith.cmpf oge, %80, %81 : vector<16x352xf32>
    %83 = vector.broadcast %78 : vector<1x352xf32> to vector<16x352xf32>
    %84 = arith.cmpf olt, %80, %83 : vector<16x352xf32>
    %85 = arith.andi %82, %84 : vector<16x352xi1>
    %86 = arith.extui %85 : vector<16x352xi1> to vector<16x352xi32>
    %87 = arith.sitofp %86 : vector<16x352xi32> to vector<16x352xf32>
    %88 = vector.extract_strided_slice %76 {offsets = [2, 0], sizes = [1, 320], strides = [1, 1]} : vector<11x352xf32> to vector<1x320xf32>
    %89 = vector.extract_strided_slice %76 {offsets = [3, 0], sizes = [1, 320], strides = [1, 1]} : vector<11x352xf32> to vector<1x320xf32>
    %90 = vector.extract_strided_slice %76 {offsets = [4, 0], sizes = [1, 320], strides = [1, 1]} : vector<11x352xf32> to vector<1x320xf32>
    %91 = vector.extract_strided_slice %80 {offsets = [0, 0], sizes = [16, 320], strides = [1, 1]} : vector<16x352xf32> to vector<16x320xf32>
    %92 = vector.extract_strided_slice %77 {offsets = [0, 0], sizes = [1, 320], strides = [1, 1]} : vector<1x352xf32> to vector<1x320xf32>
    %93 = vector.broadcast %92 : vector<1x320xf32> to vector<16x320xf32>
    %94 = arith.subf %91, %93 : vector<16x320xf32>
    %95 = vector.broadcast %88 : vector<1x320xf32> to vector<16x320xf32>
    %96 = arith.mulf %94, %95 : vector<16x320xf32>
    %97 = vector.extract_strided_slice %87 {offsets = [0, 0], sizes = [16, 320], strides = [1, 1]} : vector<16x352xf32> to vector<16x320xf32>
    %98 = arith.mulf %96, %97 : vector<16x320xf32>
    %99 = vector.broadcast %90 : vector<1x320xf32> to vector<16x320xf32>
    %100 = arith.subf %99, %91 : vector<16x320xf32>
    %101 = vector.broadcast %89 : vector<1x320xf32> to vector<16x320xf32>
    %102 = arith.mulf %100, %101 : vector<16x320xf32>
    %103 = vector.extract_strided_slice %87 {offsets = [0, 32], sizes = [16, 320], strides = [1, 1]} : vector<16x352xf32> to vector<16x320xf32>
    %104 = arith.mulf %102, %103 : vector<16x320xf32>
    %105 = arith.addf %98, %104 : vector<16x320xf32>
    %106 = vector.extract_strided_slice %76 {offsets = [5, 0], sizes = [1, 288], strides = [1, 1]} : vector<11x352xf32> to vector<1x288xf32>
    %107 = vector.extract_strided_slice %76 {offsets = [6, 0], sizes = [1, 288], strides = [1, 1]} : vector<11x352xf32> to vector<1x288xf32>
    %108 = vector.extract_strided_slice %76 {offsets = [7, 0], sizes = [1, 288], strides = [1, 1]} : vector<11x352xf32> to vector<1x288xf32>
    %109 = vector.extract_strided_slice %80 {offsets = [0, 0], sizes = [16, 288], strides = [1, 1]} : vector<16x352xf32> to vector<16x288xf32>
    %110 = vector.extract_strided_slice %77 {offsets = [0, 0], sizes = [1, 288], strides = [1, 1]} : vector<1x352xf32> to vector<1x288xf32>
    %111 = vector.broadcast %110 : vector<1x288xf32> to vector<16x288xf32>
    %112 = arith.subf %109, %111 : vector<16x288xf32>
    %113 = vector.broadcast %106 : vector<1x288xf32> to vector<16x288xf32>
    %114 = arith.mulf %112, %113 : vector<16x288xf32>
    %115 = vector.extract_strided_slice %105 {offsets = [0, 0], sizes = [16, 288], strides = [1, 1]} : vector<16x320xf32> to vector<16x288xf32>
    %116 = arith.mulf %114, %115 : vector<16x288xf32>
    %117 = vector.broadcast %108 : vector<1x288xf32> to vector<16x288xf32>
    %118 = arith.subf %117, %109 : vector<16x288xf32>
    %119 = vector.broadcast %107 : vector<1x288xf32> to vector<16x288xf32>
    %120 = arith.mulf %118, %119 : vector<16x288xf32>
    %121 = vector.extract_strided_slice %105 {offsets = [0, 32], sizes = [16, 288], strides = [1, 1]} : vector<16x320xf32> to vector<16x288xf32>
    %122 = arith.mulf %120, %121 : vector<16x288xf32>
    %123 = arith.addf %116, %122 : vector<16x288xf32>
    %124 = vector.extract_strided_slice %76 {offsets = [8, 0], sizes = [1, 256], strides = [1, 1]} : vector<11x352xf32> to vector<1x256xf32>
    %125 = vector.extract_strided_slice %76 {offsets = [9, 0], sizes = [1, 256], strides = [1, 1]} : vector<11x352xf32> to vector<1x256xf32>
    %126 = vector.extract_strided_slice %76 {offsets = [10, 0], sizes = [1, 256], strides = [1, 1]} : vector<11x352xf32> to vector<1x256xf32>
    %127 = vector.extract_strided_slice %80 {offsets = [0, 0], sizes = [16, 256], strides = [1, 1]} : vector<16x352xf32> to vector<16x256xf32>
    %128 = vector.extract_strided_slice %77 {offsets = [0, 0], sizes = [1, 256], strides = [1, 1]} : vector<1x352xf32> to vector<1x256xf32>
    %129 = vector.broadcast %128 : vector<1x256xf32> to vector<16x256xf32>
    %130 = arith.subf %127, %129 : vector<16x256xf32>
    %131 = vector.broadcast %124 : vector<1x256xf32> to vector<16x256xf32>
    %132 = arith.mulf %130, %131 : vector<16x256xf32>
    %133 = vector.extract_strided_slice %123 {offsets = [0, 0], sizes = [16, 256], strides = [1, 1]} : vector<16x288xf32> to vector<16x256xf32>
    %134 = arith.mulf %132, %133 : vector<16x256xf32>
    %135 = vector.broadcast %126 : vector<1x256xf32> to vector<16x256xf32>
    %136 = arith.subf %135, %127 : vector<16x256xf32>
    %137 = vector.broadcast %125 : vector<1x256xf32> to vector<16x256xf32>
    %138 = arith.mulf %136, %137 : vector<16x256xf32>
    %139 = vector.extract_strided_slice %123 {offsets = [0, 32], sizes = [16, 256], strides = [1, 1]} : vector<16x288xf32> to vector<16x256xf32>
    %140 = arith.mulf %138, %139 : vector<16x256xf32>
    %141 = arith.addf %134, %140 : vector<16x256xf32>
    %142 = arith.negf %75 : vector<16x32xf32>
    %143 = math.exp %142 : vector<16x32xf32>
    %cst_14 = arith.constant 1.000000e+00 : f32
    %144 = vector.broadcast %cst_14 : f32 to vector<16x32xf32>
    %145 = arith.addf %144, %143 : vector<16x32xf32>
    %146 = arith.divf %144, %145 : vector<16x32xf32>
    %147 = arith.mulf %75, %146 : vector<16x32xf32>
    %148 = tpu.concatenate %141, %147 in 1 : vector<16x256xf32>, vector<16x32xf32> -> vector<16x288xf32>
    %c0_15 = arith.constant 0 : index
    %c0_16 = arith.constant 0 : index
    %149 = vector.load %arg7[%c0_15, %c0_16] : memref<288x128xf32, #tpu.memory_space<vmem>>, vector<288x128xf32>
    %cst_17 = arith.constant dense<0.000000e+00> : vector<16x128xf32>
    %150 = tpu.matmul %148, %149, %cst_17 {dimension_numbers = #tpu.dot_dimension_numbers<[1], [0], [0], [1], [0, 0, 1, 1], [], []>} : vector<16x288xf32>, vector<288x128xf32>, vector<16x128xf32> -> vector<16x128xf32>
    %c0_18 = arith.constant 0 : index
    %c0_19 = arith.constant 0 : index
    %151 = vector.load %arg8[%c0_18, %c0_19] : memref<16x128xf32, #tpu.memory_space<vmem>>, vector<16x128xf32>
    tpu.vector_store %arg8[%c0_18, %c0_19], %150 {strides = array<i32>} : memref<16x128xf32, #tpu.memory_space<vmem>>, vector<16x128xf32>,
    return
  }
  func.func @transform_0(%arg0: i32) -> (i32, i32) {
    %c0_i32 = arith.constant 0 : i32
    %c0_i32_0 = arith.constant 0 : i32
    return %arg0, %c0_i32 : i32, i32
  }
  func.func @transform_1(%arg0: i32) -> (i32, i32) {
    %c0_i32 = arith.constant 0 : i32
    %c0_i32_0 = arith.constant 0 : i32
    %c0_i32_1 = arith.constant 0 : i32
    return %c0_i32, %c0_i32_0 : i32, i32
  }
  func.func @transform_2(%arg0: i32) -> (i32, i32) {
    %c0_i32 = arith.constant 0 : i32
    %c0_i32_0 = arith.constant 0 : i32
    %c0_i32_1 = arith.constant 0 : i32
    return %c0_i32, %c0_i32_0 : i32, i32
  }
  func.func @transform_3(%arg0: i32) -> (i32, i32) {
    %c0_i32 = arith.constant 0 : i32
    %c0_i32_0 = arith.constant 0 : i32
    %c0_i32_1 = arith.constant 0 : i32
    return %c0_i32, %c0_i32_0 : i32, i32
  }
  func.func @transform_4(%arg0: i32) -> (i32, i32) {
    %c0_i32 = arith.constant 0 : i32
    %c0_i32_0 = arith.constant 0 : i32
    %c0_i32_1 = arith.constant 0 : i32
    return %c0_i32, %c0_i32_0 : i32, i32
  }
  func.func @transform_5(%arg0: i32) -> (i32, i32) {
    %c0_i32 = arith.constant 0 : i32
    %c0_i32_0 = arith.constant 0 : i32
    %c0_i32_1 = arith.constant 0 : i32
    return %c0_i32, %c0_i32_0 : i32, i32
  }
  func.func @transform_6(%arg0: i32) -> (i32, i32) {
    %c0_i32 = arith.constant 0 : i32
    %c0_i32_0 = arith.constant 0 : i32
    %c0_i32_1 = arith.constant 0 : i32
    return %c0_i32, %c0_i32_0 : i32, i32
  }
  func.func @transform_7(%arg0: i32) -> (i32, i32) {
    %c0_i32 = arith.constant 0 : i32
    %c0_i32_0 = arith.constant 0 : i32
    return %arg0, %c0_i32 : i32, i32
  }
}

</mosaic_0001>

<bundles_post_ra>
// kernel: tpu_custom_call.1
= control target key start
LH: loop header
LB: loop body
LE: loop exit
PB: predicated region body
PF: predicated region fallthrough
CT: control target
= control target key end

     0   :  { %12 = vsyncpa [#allocation3], 0  ;;  %s1611_s0 = inlined_call_operand.hbm [shape: f32[16,16], index: 0, kind: input, shape index: {}]   ;;  %s1612_s1 = inlined_call_operand.vmem [shape: f32[16,176], index: 1, kind: input, shape index: {}]   ;;  %s1613_s2 = inlined_call_operand.vmem [shape: f32[11,176], index: 2, kind: input, shape index: {}]   ;;  %s1614_s3 = inlined_call_operand.vmem [shape: f32[144,32], index: 3, kind: input, shape index: {}]   ;;  %s1615_s4 = inlined_call_operand.vmem [shape: f32[32,352], index: 4, kind: input, shape index: {}]   ;;  %s1616_s5 = inlined_call_operand.vmem [shape: f32[11,352], index: 5, kind: input, shape index: {}]   ;;  %s1617_s6 = inlined_call_operand.hbm [shape: f32[288,128], index: 6, kind: input, shape index: {}]   ;;  %s1618_s7 = inlined_call_operand.hbm [shape: f32[16,128], index: 7, kind: output, shape index: {}]  }
   0x1   :  { %13 = vsyncpa [#allocation6], 0 }
   0x2   :  { %14 = vsyncpa [#allocation4], 0  ;;  %s19_s26 = sshll.u32 %s1611_s0, 4  ;;  %s1053_s27 = smov [#allocation2]   ;;  %s20_s26 = int_to_ptr.hbm [resolvable:$true] %s19_s26 }
   0x3   :  { %s21_s28 = sshll.u32 %s1053_s27, 4  ;;  %s42_s8 = sshll.u32 %s1617_s6, 4  ;;  %s22_s28 = int_to_ptr.vmem [resolvable:$true] %s21_s28  ;;  %s43_s8 = int_to_ptr.hbm [resolvable:$true] %s42_s8 }
   0x4   :  { %s1054_s9 = smov 128   ;;  %s1055_s10 = smov 8  }
   0x5   :  { %27 = dma.hbm_to_vmem [thread:$0]  %s20_s26, 256, %s22_s28, [#allocation3], %s1054_s9, %s1054_s9, %s1055_s10  }
   0x6   :  { %s1056_s11 = smov [#allocation5]  }
   0x7   :  { %s44_s12 = sshll.u32 %s1056_s11, 4  ;;  %s45_s12 = int_to_ptr.vmem [resolvable:$true] %s44_s12 }
   0x8   :  { %50 = dma.hbm_to_vmem [thread:$0]  %s43_s8, 4608, %s45_s12, [#allocation6], %s1054_s9, %s1054_s9, %s1055_s10  }
   0x9   :  { %1047 = dma.done.wait [#allocation3], 256  }
   0xa   :  { %1048 = vsyncadd [#allocation3], 4294967040 }
   0xb   :  { %1049 = dma.done.wait [#allocation6], 4608  }
   0xc   :  { %1050 = vsyncadd [#allocation6], 4294962688  ;;  %v66_v0 = vld [vmem:[%s1612_s1 + $0x10] sm:$0xff]  ;;  %v64_v1 = vld [vmem:[%s1612_s1] sm:$0xff]  ;;  %vm68_vm0 = vcmask 130048   ;;  %v1057_v24 = vmov 0.0  }
   0xd   :  { %89 = vmatpush.msra.mxu2 %v66_v0  ;;  %v1119_v2 = vld [vmem:[#allocation2] sm:$0xff]  ;;  %v67_v3 = vld [vmem:[%s1612_s1 + $0x18] sm:$0xff]  ;;  %v65_v4 = vld [vmem:[%s1612_s1 + $0x8] sm:$0xff]  ;;  %s1058_s22 = smov 112   ;;  %vm183_vm13 = vcmask 916480   ;;  %s1059_s14 = smov 96  }
   0xe   :  { %112 = vmatpush.msra.mxu1 %v67_v3  ;;  %v1131_v5 = vld [vmem:[#allocation2 + $0x8] sm:$0xff]  ;;  %v1145_v7 = vld [vmem:[%s1613_s2] sm:$0xff]  ;;  %s884_s21 = sshll.u32 %s1618_s7, 4  ;;  %s885_s21 = int_to_ptr.hbm [resolvable:$true] %s884_s21 }
   0xf   :  { %90 = vmatpush.msra.mxu2 %v64_v1  ;;  %v1140_v6 = vld [vmem:[%s1613_s2 + $0x8] sm:$0xff]  ;;  %v121_v16 = vperm.slane %v1145_v7, 0  ;;  %v127_v20 = vperm.slane %v1145_v7, 1  ;;  %v159_v21 = vperm.slane %v1145_v7, 4  ;;  %v208_v22 = vperm.slane %v1145_v7, 7 }
  0x10   :  { %898 = vmatmul.msk.f32.vlgmr.msra.gmra.mxu2 %vm68_vm0, %v1119_v2  ;;  %113 = vmatpush.msra.mxu1 %v65_v4  ;;  %v122_v8 = vperm.slane %v1140_v6, 0  ;;  %v128_v9 = vperm.slane %v1140_v6, 1  ;;  %v160_v10 = vperm.slane %v1140_v6, 4  ;;  %v209_v11 = vperm.slane %v1140_v6, 7 }
  0x11   :  { %900 = vmatmul.msk.f32.vlgmr.msra.gmra.mxu1 %vm68_vm0, %v1119_v2  ;;  %v150_v12 = vperm.slane %v1140_v6, 2  ;;  %v166_v13 = vperm.slane %v1140_v6, 3  ;;  %v199_v14 = vperm.slane %v1140_v6, 5  ;;  %v215_v17 = vperm.slane %v1140_v6, 6 }
  0x12   :  { %v149_v29 = vperm.slane %v1145_v7, 2  ;;  %v165_v30 = vperm.slane %v1145_v7, 3  ;;  %v198_v31 = vperm.slane %v1145_v7, 5  ;;  %v214_v35 = vperm.slane %v1145_v7, 6 }
  0x18   :  { %899 = vmatmul.msk.f32.gmra.mxu2 %vm68_vm0, %v1131_v5 }
  0x19   :  { %901 = vmatmul.msk.f32.gmra.mxu1 %vm68_vm0, %v1131_v5 }
  0x8e   :  { %v115_v15 = vpop.f32.mrf.mxu1 }
  0x8f   :  { %vm124_vm1 = vcmp.ge.f32.partialorder %v115_v15, %v122_v8  ;;  %vm130_vm2 = vcmp.lt.f32.partialorder %v115_v15, %v128_v9  ;;  %v146_v18 = vsub.f32 %v115_v15, %v122_v8  ;;  %v162_v19 = vsub.f32 %v160_v10, %v115_v15 }
  0x90   :  { %vm134_vm3 = vmand %vm124_vm1, %vm130_vm2  ;;  %v211_v23 = vsub.f32 %v209_v11, %v115_v15 }
  0x91   :  { %v903_v25 = vsel %vm134_vm3, 1.0, %v1057_v24  ;;  %v152_v26 = vmul.f32 %v150_v12, %v146_v18  ;;  %v168_v27 = vmul.f32 %v166_v13, %v162_v19  ;;  %v201_v28 = vmul.f32 %v199_v14, %v146_v18 }
  0x92   :  { %v1171_v32 = vmul.f32 %v215_v17, %v211_v23 }
  0x93   :  { %v1173_v33 = vpop.f32.mrf.mxu2  ;;  %v156_v34 = vmul.f32 %v903_v25, %v152_v26 }
  0x94   :  { %vm123_vm4 = vcmp.ge.f32.partialorder %v1173_v33, %v121_v16  ;;  %vm129_vm5 = vcmp.lt.f32.partialorder %v1173_v33, %v127_v20  ;;  %v1179_v36 = vsub.f32 %v1173_v33, %v121_v16  ;;  %v161_v37 = vsub.f32 %v159_v21, %v1173_v33 }
  0x95   :  { %vm133_vm6 = vmand %vm123_vm4, %vm129_vm5  ;;  %v210_v38 = vsub.f32 %v208_v22, %v1173_v33 }
  0x96   :  { %v902_v39 = vsel %vm133_vm6, 1.0, %v1057_v24  ;;  %v118_v40 = vpop.f32.mrf.mxu1  ;;  %v151_v41 = vmul.f32 %v149_v29, %v1179_v36  ;;  %v167_v42 = vmul.f32 %v165_v30, %v161_v37  ;;  %v200_v43 = vmul.f32 %v198_v31, %v1179_v36 }
  0x97   :  { %v934_v44 = vpack.i.bf16 %v903_v25, %v902_v39  ;;  %v148_v45 = vsub.f32 %v118_v40, %v122_v8  ;;  %vm126_vm7 = vcmp.ge.f32.partialorder %v118_v40, %v122_v8  ;;  %vm132_vm8 = vcmp.lt.f32.partialorder %v118_v40, %v128_v9 }
  0x98   :  { %vm136_vm9 = vmand %vm126_vm7, %vm132_vm8  ;;  %v155_v46 = vmul.f32 %v902_v39, %v151_v41  ;;  %v1190_v47 = vmul.f32 %v214_v35, %v210_v38  ;;  %v164_v1 = vsub.f32 %v160_v10, %v118_v40  ;;  %v1225_v39 = vld [vmem:[%s1613_s2 + $0x10] sm:$0x7] }
  0x99   :  { %935 = vrot.lane.b32.xlu0 %v934_v44, %s1058_s22  ;;  %v154_v48 = vmul.f32 %v150_v12, %v148_v45  ;;  %v203_v49 = vmul.f32 %v199_v14, %v148_v45  ;;  %v905_v50 = vsel %vm136_vm9, 1.0, %v1057_v24 }
  0x9a   :  { %v170_v15 = vmul.f32 %v166_v13, %v164_v1  ;;  %v213_v13 = vsub.f32 %v209_v11, %v118_v40  ;;  %v246_v40 = vperm.slane %v1225_v39, 0 }
  0x9b   :  { %v1194_v51 = vpop.f32.mrf.mxu2  ;;  %v158_v52 = vmul.f32 %v905_v50, %v154_v48 }
  0x9c   :  { %vm125_vm10 = vcmp.ge.f32.partialorder %v1194_v51, %v121_v16  ;;  %vm131_vm11 = vcmp.lt.f32.partialorder %v1194_v51, %v127_v20  ;;  %v147_v53 = vsub.f32 %v1194_v51, %v121_v16  ;;  %v163_v8 = vsub.f32 %v159_v21, %v1194_v51 }
  0x9d   :  { %vm135_vm12 = vmand %vm125_vm10, %vm131_vm11  ;;  %v247_v48 = vmul.f32 %v246_v40, %v1179_v36  ;;  %v330_v36 = vld [vmem:[%s1614_s3 + $0x68] sm:$0xff] }
  0x9e   :  { %v904_v54 = vsel %vm135_vm12, 1.0, %v1057_v24  ;;  %v153_v55 = vmul.f32 %v149_v29, %v147_v53  ;;  %v202_v56 = vmul.f32 %v198_v31, %v147_v53  ;;  %v169_v19 = vmul.f32 %v165_v30, %v163_v8 }
  0x9f   :  { %v939_v57 = vpack.i.bf16 %v905_v50, %v904_v54  ;;  %v212_v29 = vsub.f32 %v208_v22, %v1194_v51  ;;  %v219_v30 = vmul.f32 %v215_v17, %v213_v13  ;;  %v332_v50 = vld [vmem:[%s1614_s3 + $0x78] sm:$0xff] }
  0xa0   :  { %v157_v58 = vmul.f32 %v904_v54, %v153_v55  ;;  %341 = vmatpush.msrb.mxu2 %v332_v50  ;;  %v326_v54 = vld [vmem:[%s1614_s3 + $0x48] sm:$0xff]  ;;  %v906_v55 = vmul.f32 -1.442695, %v1119_v2 }
  0xa1   :  { %940 = vrot.lane.b32.xlu0 %v939_v57, %s1058_s22  ;;  %v218_v31 = vmul.f32 %v214_v35, %v212_v29  ;;  %v324_v57 = vld [vmem:[%s1614_s3 + $0x38] sm:$0xff] }
  0xa2   :  { %959 = vpow2.f32 %v906_v55 }
 0x10b   :  { %v936_v59 = vpop.permute.xlu0 %935 }
 0x10c   :  { %v938_v60 = vunpack.i.h.bf16 %v936_v59  ;;  %v937_v61 = vunpack.i.l.bf16 %v936_v59  ;;  %v322_v59 = vld [vmem:[%s1614_s3 + $0x28] sm:$0xff] }
 0x10e   :  { %v191_v62 = vmul.f32 %v938_v60, %v168_v27  ;;  %v184_v63 = vsel %vm183_vm13, %v937_v61, %v938_v60  ;;  %v907_v60 = vmul.f32 -1.442695, %v1131_v5  ;;  %v321_v61 = vld [vmem:[%s1614_s3 + $0x20] sm:$0xff] }
 0x10f   :  { %v190_v0 = vmul.f32 %v184_v63, %v167_v42  ;;  %v248_v42 = vmul.f32 %v246_v40, %v147_v53  ;;  %v327_v53 = vld [vmem:[%s1614_s3 + $0x50] sm:$0xff]  ;;  %v320_v63 = vld [vmem:[%s1614_s3 + $0x18] sm:$0xff] }
 0x110   :  { %v195_v3 = vadd.f32 %v191_v62, %v156_v34  ;;  %v960_v62 = vpop.eup %959  ;;  %961 = vpow2.f32 %v907_v60  ;;  %v403_v40 = vld [vmem:[%s1615_s4 + $0x58] sm:$0xff]  ;;  %v799_v60 = vld [vmem:[#allocation5 + $0x110] sm:$0xff] }
 0x111   :  { %v194_v4 = vadd.f32 %v190_v0, %v155_v46  ;;  %v283_v0 = vadd.f32 1.0, %v960_v62  ;;  %v797_v62 = vld [vmem:[#allocation5 + $0x100] sm:$0xff] }
 0x112   :  { %v205_v9 = vmul.f32 %v201_v28, %v195_v3 }
 0x113   :  { %224 = vrot.lane.b32.xlu1 %v194_v4, %s1058_s22  ;;  %v204_v12 = vmul.f32 %v200_v43, %v194_v4  ;;  %v941_v14 = vpop.permute.xlu0 %940  ;;  %963 = vrcp.f32 %v283_v0  ;;  %vm290_vm14 = vweird.f32 %v283_v0 }
 0x114   :  { %v943_v16 = vunpack.i.h.bf16 %v941_v14  ;;  %v942_v18 = vunpack.i.l.bf16 %v941_v14  ;;  %v318_v14 = vld [vmem:[%s1614_s3 + $0x8] sm:$0xff] }
 0x116   :  { %v193_v20 = vmul.f32 %v943_v16, %v170_v15  ;;  %v185_v23 = vsel %vm183_vm13, %v942_v18, %v943_v16  ;;  %v962_v1 = vpop.eup %961  ;;  %v334_v15 = vld [vmem:[%s1614_s3 + $0x88] sm:$0xff] }
 0x117   :  { %v192_v25 = vmul.f32 %v185_v23, %v169_v19  ;;  %378 = vmatpush.msra.mxu3 %v334_v15  ;;  %v333_v19 = vld [vmem:[%s1614_s3 + $0x80] sm:$0xff] }
 0x118   :  { %v197_v10 = vadd.f32 %v193_v20, %v158_v52  ;;  %v328_v52 = vld [vmem:[%s1614_s3 + $0x58] sm:$0xff]  ;;  %v296_v20 = vand.u32 2147483648, %v283_v0  ;;  %v317_v23 = vld [vmem:[%s1614_s3] sm:$0xff] }
 0x119   :  { %v196_v26 = vadd.f32 %v192_v25, %v157_v58  ;;  %v323_v58 = vld [vmem:[%s1614_s3 + $0x30] sm:$0xff]  ;;  %v964_v4 = vpop.eup %963  ;;  %379 = vmatpush.msra.mxu3 %v333_v19 }
 0x11a   :  { %v207_v27 = vmul.f32 %v203_v49, %v197_v10  ;;  %v286_v8 = vmul.f32 %v964_v4, %v283_v0  ;;  %vm291_vm15 = vweird.f32 %v964_v4 }
 0x11b   :  { %226 = vrot.lane.b32.xlu1 %v195_v3, %s1058_s22  ;;  %228 = vrot.lane.b32.xlu2 %v196_v26, %s1058_s22  ;;  %v206_v21 = vmul.f32 %v202_v56, %v196_v26  ;;  %v325_v56 = vld [vmem:[%s1614_s3 + $0x40] sm:$0xff]  ;;  %v284_v3 = vadd.f32 1.0, %v962_v1  ;;  %vm292_vm1 = vmor %vm290_vm14, %vm291_vm15  ;;  %v297_v26 = vor.u32 1.1754944e-38, %v296_v20 }
 0x11c   :  { %469 = vmatpush.msrb.mxu3 %v403_v40 }
 0x11d   :  { %965 = vrcp.f32 %v284_v3  ;;  %vm305_vm3 = vweird.f32 %v284_v3 }
 0x123   :  { %230 = vrot.lane.b32.xlu2 %v197_v10, %s1058_s22  ;;  %v966_v18 = vpop.eup %965  ;;  %v294_v10 = vand.u32 2147483647, %v283_v0 }
 0x124   :  { %vm306_vm4 = vweird.f32 %v966_v18 }
 0x125   :  { %vm295_vm2 = vcmp.eq.f32.partialorder %v294_v10, 8.507059e+37  ;;  %vm307_vm5 = vmor %vm305_vm3, %vm306_vm4 }
 0x175   :  { %v229_v28 = vpop.permute.xlu2 %228 }
 0x17d   :  { %v231_v34 = vpop.permute.xlu2 %230 }
 0x17e   :  { %v233_v37 = vsel %vm183_vm13, %v229_v28, %v231_v34  ;;  %v241_v38 = vmul.f32 %v231_v34, %v219_v30 }
 0x17f   :  { %v240_v11 = vmul.f32 %v233_v37, %v218_v31  ;;  %v311_v31 = vand.u32 2147483648, %v284_v3  ;;  %v309_v37 = vand.u32 2147483647, %v284_v3 }
 0x180   :  { %v245_v41 = vadd.f32 %v241_v38, %v207_v27 }
 0x181   :  { %v244_v22 = vadd.f32 %v240_v11, %v206_v21  ;;  %v301_v21 = vmul.f32 %v966_v18, %v284_v3  ;;  %v312_v38 = vor.u32 1.1754944e-38, %v311_v31  ;;  %vm310_vm6 = vcmp.eq.f32.partialorder %v309_v37, 8.507059e+37 }
 0x183   :  { %265 = vrot.lane.b32.xlu2 %v244_v22, %s1058_s22  ;;  %v1229_v6 = vmul.f32 %v248_v42, %v244_v22  ;;  %v302_v29 = vsub.f32 1.0, %v301_v21  ;;  %v401_v42 = vld [vmem:[%s1615_s4 + $0x48] sm:$0xff] }
 0x184   :  { %423 = vmatpush.msra.mxu0 %v401_v42 }
 0x185   :  { %v225_v7 = vpop.permute.xlu1 %224  ;;  %v303_v30 = vmul.f32 %v966_v18, %v302_v29 }
 0x187   :  { %v304_v34 = vadd.f32 %v966_v18, %v303_v30 }
 0x189   :  { %v308_v11 = vsel %vm307_vm5, %v966_v18, %v304_v34 }
 0x18a   :  { %v313_v22 = vsel %vm310_vm6, %v312_v38, %v308_v11 }
 0x18d   :  { %v227_v17 = vpop.permute.xlu1 %226 }
 0x18e   :  { %v232_v35 = vsel %vm183_vm13, %v225_v7, %v227_v17  ;;  %v239_v43 = vmul.f32 %v227_v17, %v1171_v32  ;;  %v331_v32 = vld [vmem:[%s1614_s3 + $0x70] sm:$0xff]  ;;  %v399_v7 = vld [vmem:[%s1615_s4 + $0x38] sm:$0xff]  ;;  %v316_v17 = vmul.f32 %v313_v22, %v1131_v5  ;;  %v251_v5 = vperm.slane %v1225_v39, 2 }
 0x18f   :  { %v238_v44 = vmul.f32 %v232_v35, %v1190_v47  ;;  %342 = vmatpush.msrb.mxu2 %v331_v32  ;;  %v329_v47 = vld [vmem:[%s1614_s3 + $0x60] sm:$0xff]  ;;  %v397_v35 = vld [vmem:[%s1615_s4 + $0x28] sm:$0xff] }
 0x190   :  { %v243_v45 = vadd.f32 %v239_v43, %v205_v9  ;;  %v287_v9 = vsub.f32 1.0, %v286_v8  ;;  %v398_v43 = vld [vmem:[%s1615_s4 + $0x30] sm:$0xff] }
 0x191   :  { %v242_v46 = vadd.f32 %v238_v44, %v204_v12  ;;  %343 = vmatpush.msrb.mxu2 %v330_v36  ;;  %v319_v12 = vld [vmem:[%s1614_s3 + $0x10] sm:$0xff]  ;;  %424 = vmatpush.msra.mxu0 %v398_v43 }
 0x192   :  { %263 = vrot.lane.b32.xlu1 %v243_v45, %s1058_s22  ;;  %v288_v16 = vmul.f32 %v964_v4, %v287_v9  ;;  %v394_v44 = vld [vmem:[%s1615_s4 + $0x10] sm:$0xff]  ;;  %v252_v45 = vsub.f32 %v251_v5, %v1173_v33 }
 0x193   :  { %261 = vrot.lane.b32.xlu0 %v242_v46, %s1058_s22  ;;  %v1237_v49 = vmul.f32 %v247_v48, %v242_v46  ;;  %344 = vmatpush.msrb.mxu2 %v329_v47  ;;  %v254_v46 = vperm.slane %v1225_v39, 1  ;;  %v395_v39 = vld [vmem:[%s1615_s4 + $0x18] sm:$0xff] }
 0x194   :  { %v289_v25 = vadd.f32 %v964_v4, %v288_v16  ;;  %425 = vmatpush.msra.mxu0 %v395_v39 }
 0x195   :  { %345 = vmatpush.msrb.mxu2 %v328_v52  ;;  %v255_v50 = vmul.f32 %v254_v46, %v252_v45 }
 0x196   :  { %v293_v27 = vsel %vm292_vm1, %v964_v4, %v289_v25 }
 0x197   :  { %346 = vmatpush.msrb.mxu2 %v327_v53  ;;  %v298_v28 = vsel %vm295_vm2, %v297_v26, %v293_v27  ;;  %v253_v53 = vsub.f32 %v251_v5, %v1194_v51  ;;  %v392_v51 = vld [vmem:[%s1615_s4] sm:$0xff] }
 0x198   :  { %v315_v13 = vmul.f32 %v298_v28, %v1119_v2  ;;  %v400_v2 = vld [vmem:[%s1615_s4 + $0x40] sm:$0xff]  ;;  %426 = vmatpush.msra.mxu0 %v392_v51 }
 0x199   :  { %347 = vmatpush.msrb.mxu2 %v326_v54  ;;  %470 = vmatpush.msrb.mxu3 %v400_v2  ;;  %v256_v55 = vmul.f32 %v254_v46, %v253_v53 }
 0x19a   :  { %908 = vmatmul.msk.f32.vlgmr.msra.gmra.mxu3 %vm68_vm0, %v315_v13 }
 0x19b   :  { %267 = vrot.lane.b32.xlu0 %v245_v41, %s1058_s22  ;;  %348 = vmatpush.msrb.mxu2 %v325_v56  ;;  %v402_v41 = vld [vmem:[%s1615_s4 + $0x50] sm:$0xff] }
 0x19c   :  { %446 = vmatpush.msrb.mxu1 %v402_v41  ;;  %471 = vmatpush.msrb.mxu3 %v397_v35 }
 0x19d   :  { %349 = vmatpush.msrb.mxu2 %v324_v57 }
 0x19e   :  { %447 = vmatpush.msrb.mxu1 %v399_v7  ;;  %472 = vmatpush.msrb.mxu3 %v394_v44  ;;  %v1355_v7 = vld [vmem:[%s1616_s5] sm:$0xff]  ;;  %v1371_v44 = vld [vmem:[%s1616_s5 + $0x10] sm:$0xff] }
 0x19f   :  { %350 = vmatpush.msrb.mxu2 %v323_v58  ;;  %v1363_v35 = vperm.slane %v1355_v7, 0  ;;  %v489_v5 = vperm.slane %v1355_v7, 1  ;;  %v537_v46 = vperm.slane %v1355_v7, 4  ;;  %v620_v39 = vperm.slane %v1355_v7, 6 }
 0x1a1   :  { %351 = vmatpush.msrb.mxu2 %v322_v59  ;;  %v393_v59 = vld [vmem:[%s1615_s4 + $0x8] sm:$0xff] }
 0x1a2   :  { %909 = vmatmul.msk.f32.gmra.mxu3 %vm68_vm0, %v316_v17  ;;  %vm404_vm0 = vcmask 261120   ;;  %v1360_v17 = vld [vmem:[%s1616_s5 + $0x8] sm:$0xff] }
 0x1a3   :  { %352 = vmatpush.msrb.mxu2 %v321_v61  ;;  %v798_v61 = vld [vmem:[#allocation5 + $0x108] sm:$0xff]  ;;  %v1366_v43 = vperm.slane %v1360_v17, 0  ;;  %v490_v45 = vperm.slane %v1360_v17, 1  ;;  %v547_v53 = vperm.slane %v1360_v17, 3 }
 0x1a5   :  { %353 = vmatpush.msrb.mxu2 %v320_v63 }
 0x1a7   :  { %354 = vmatpush.msrb.mxu2 %v319_v12 }
 0x1a9   :  { %355 = vmatpush.msrb.mxu2 %v318_v14 }
 0x1ab   :  { %356 = vmatpush.msrb.mxu2 %v317_v23 }
 0x1dd   :  { %v266_v54 = vpop.permute.xlu2 %265 }
 0x204   :  { %v264_v48 = vpop.permute.xlu1 %263 }
 0x205   :  { %v262_v32 = vpop.permute.xlu0 %261 }
 0x206   :  { %v269_v36 = vsel %vm183_vm13, %v262_v32, %v264_v48  ;;  %v538_v48 = vperm.slane %v1360_v17, 4  ;;  %v546_v32 = vperm.slane %v1355_v7, 3 }
 0x207   :  { %v273_v47 = vmul.f32 %v269_v36, %v255_v50  ;;  %v522_v50 = vperm.slane %v1355_v7, 2  ;;  %v523_v36 = vperm.slane %v1360_v17, 2 }
 0x209   :  { %v275_v52 = vadd.f32 %v273_v47, %v1237_v49  ;;  %v396_v49 = vld [vmem:[%s1615_s4 + $0x20] sm:$0xff]  ;;  %v612_v47 = vperm.slane %v1360_v17, 7 }
 0x20a   :  { %448 = vmatpush.msrb.mxu1 %v396_v49  ;;  %v596_v49 = vperm.slane %v1355_v7, 5 }
 0x20b   :  { %357 = vmatmul.f32.vlgmr.msrb.gmra.mxu2 %v275_v52  ;;  %v1382_v52 = vperm.slane %v1371_v44, 0 }
 0x20c   :  { %449 = vmatpush.msrb.mxu1 %v393_v59 }
 0x20d   :  { %v268_v56 = vpop.permute.xlu0 %267 }
 0x20e   :  { %v270_v57 = vsel %vm183_vm13, %v266_v54, %v268_v56  ;;  %v597_v54 = vperm.slane %v1360_v17, 5 }
 0x20f   :  { %v274_v58 = vmul.f32 %v270_v57, %v256_v55  ;;  %v611_v55 = vperm.slane %v1355_v7, 7 }
 0x211   :  { %v276_v33 = vadd.f32 %v274_v58, %v1229_v6  ;;  %v800_v6 = vld [vmem:[#allocation5 + $0x118] sm:$0xff]  ;;  %v491_v58 = vperm.slane %v1371_v44, 1 }
 0x212   :  { %865 = vmatpush.msra.mxu3 %v800_v6 }
 0x213   :  { %360 = vmatmul.f32.gmra.mxu2 %v276_v33  ;;  %v621_v33 = vperm.slane %v1360_v17, 6 }
 0x214   :  { %866 = vmatpush.msra.mxu3 %v799_v60 }
 0x216   :  { %867 = vmatpush.msra.mxu3 %v798_v61 }
 0x218   :  { %868 = vmatpush.msra.mxu3 %v797_v62 }
 0x21d   :  { %v381_v63 = vpop.f32.mrf.mxu3 }
 0x225   :  { %v384_v4 = vpop.f32.mrf.mxu3 }
 0x28e   :  { %v358_v0 = vpop.f32.mrf.mxu2 }
 0x28f   :  { %v382_v1 = vadd.f32 %v381_v63, %v358_v0 }
 0x291   :  { %v922_v3 = vmul.f32 -1.442695, %v382_v1  ;;  %910 = vmatmul.msk.f32.vlgmr.msra.gmra.mxu0 %vm404_vm0, %v382_v1  ;;  %912 = vmatmul.msk.f32.vlgmr.msrb.gmra.mxu1 %vm404_vm0, %v382_v1 }
 0x292   :  { %914 = vmatmul.msk.f32.vlgmr.msrb.gmra.mxu3 %vm404_vm0, %v382_v1 }
 0x293   :  { %967 = vpow2.f32 %v922_v3  ;;  %v539_v3 = vperm.slane %v1371_v44, 4 }
 0x296   :  { %v361_v8 = vpop.f32.mrf.mxu2 }
 0x297   :  { %v385_v9 = vadd.f32 %v384_v4, %v361_v8 }
 0x299   :  { %v968_v12 = vpop.eup %967  ;;  %v923_v14 = vmul.f32 -1.442695, %v385_v9  ;;  %911 = vmatmul.msk.f32.gmra.mxu0 %vm404_vm0, %v385_v9  ;;  %913 = vmatmul.msk.f32.gmra.mxu1 %vm404_vm0, %v385_v9 }
 0x29a   :  { %v731_v15 = vadd.f32 1.0, %v968_v12  ;;  %915 = vmatmul.msk.f32.gmra.mxu3 %vm404_vm0, %v385_v9 }
 0x29b   :  { %969 = vpow2.f32 %v923_v14 }
 0x29c   :  { %971 = vrcp.f32 %v731_v15  ;;  %v744_v25 = vand.u32 2147483648, %v731_v15  ;;  %v742_v26 = vand.u32 2147483647, %v731_v15  ;;  %vm738_vm8 = vweird.f32 %v731_v15 }
 0x29e   :  { %v745_v28 = vor.u32 1.1754944e-38, %v744_v25  ;;  %vm743_vm10 = vcmp.eq.f32.partialorder %v742_v26, 8.507059e+37  ;;  %v524_v25 = vperm.slane %v1371_v44, 2  ;;  %v613_v26 = vperm.slane %v1371_v44, 7 }
 0x2a1   :  { %v970_v16 = vpop.eup %969 }
 0x2a2   :  { %v972_v18 = vpop.eup %971  ;;  %v732_v19 = vadd.f32 1.0, %v970_v16 }
 0x2a3   :  { %v734_v20 = vmul.f32 %v972_v18, %v731_v15  ;;  %vm739_vm7 = vweird.f32 %v972_v18 }
 0x2a4   :  { %973 = vrcp.f32 %v732_v19  ;;  %vm740_vm9 = vmor %vm738_vm8, %vm739_vm7  ;;  %v759_v37 = vand.u32 2147483648, %v732_v19  ;;  %v757_v11 = vand.u32 2147483647, %v732_v19  ;;  %vm753_vm12 = vweird.f32 %v732_v19 }
 0x2a5   :  { %v735_v23 = vsub.f32 1.0, %v734_v20 }
 0x2a6   :  { %v760_v2 = vor.u32 1.1754944e-38, %v759_v37  ;;  %vm758_vm14 = vcmp.eq.f32.partialorder %v757_v11, 8.507059e+37 }
 0x2a7   :  { %v736_v10 = vmul.f32 %v972_v18, %v735_v23 }
 0x2a9   :  { %v737_v27 = vadd.f32 %v972_v18, %v736_v10  ;;  %v598_v10 = vperm.slane %v1371_v44, 5 }
 0x2aa   :  { %v974_v21 = vpop.eup %973 }
 0x2ab   :  { %v741_v13 = vsel %vm740_vm9, %v972_v18, %v737_v27  ;;  %v749_v29 = vmul.f32 %v974_v21, %v732_v19  ;;  %vm754_vm11 = vweird.f32 %v974_v21  ;;  %v548_v18 = vperm.slane %v1371_v44, 3 }
 0x2ac   :  { %v746_v30 = vsel %vm743_vm10, %v745_v28, %v741_v13  ;;  %vm755_vm13 = vmor %vm753_vm12, %vm754_vm11 }
 0x2ad   :  { %v763_v31 = vmul.f32 %v746_v30, %v382_v1  ;;  %v750_v34 = vsub.f32 1.0, %v749_v29 }
 0x2af   :  { %924 = vmatmul.msk.f32.vlgmr.msra.gmra.mxu3 %vm404_vm0, %v763_v31  ;;  %v751_v38 = vmul.f32 %v974_v21, %v750_v34 }
 0x2b1   :  { %v752_v40 = vadd.f32 %v974_v21, %v751_v38 }
 0x2b3   :  { %v756_v41 = vsel %vm755_vm13, %v974_v21, %v752_v40 }
 0x2b4   :  { %v761_v22 = vsel %vm758_vm14, %v760_v2, %v756_v41 }
 0x2b5   :  { %v764_v42 = vmul.f32 %v761_v22, %v385_v9 }
 0x2b7   :  { %925 = vmatmul.msk.f32.gmra.mxu3 %vm404_vm0, %v764_v42 }
 0x30e   :  { %v1387_v56 = vpop.f32.mrf.mxu0  ;;  %v1389_v57 = vpop.f32.mrf.mxu1 }
 0x30f   :  { %v1397_v51 = vsub.f32 %v1387_v56, %v1363_v35  ;;  %v1401_v59 = vsub.f32 %v1389_v57, %v1366_v43  ;;  %vm483_vm15 = vcmp.ge.f32.partialorder %v1387_v56, %v1363_v35  ;;  %vm484_vm1 = vcmp.ge.f32.partialorder %v1389_v57, %v1366_v43 }
 0x310   :  { %vm492_vm2 = vcmp.lt.f32.partialorder %v1387_v56, %v489_v5  ;;  %vm493_vm3 = vcmp.lt.f32.partialorder %v1389_v57, %v490_v45  ;;  %v540_v6 = vsub.f32 %v537_v46, %v1387_v56  ;;  %v541_v60 = vsub.f32 %v538_v48, %v1389_v57 }
 0x311   :  { %vm498_vm4 = vmand %vm483_vm15, %vm492_vm2  ;;  %v525_v61 = vmul.f32 %v522_v50, %v1397_v51  ;;  %v526_v62 = vmul.f32 %v523_v36, %v1401_v59  ;;  %v615_v63 = vsub.f32 %v612_v47, %v1389_v57  ;;  %v1429_v0 = vmul.f32 %v597_v54, %v1401_v59 }
 0x312   :  { %vm499_vm5 = vmand %vm484_vm1, %vm493_vm3  ;;  %v916_v1 = vsel %vm498_vm4, 1.0, %v1057_v24  ;;  %v1435_v4 = vmul.f32 %v546_v32, %v540_v6  ;;  %v1439_v8 = vmul.f32 %v547_v53, %v541_v60  ;;  %v614_v15 = vsub.f32 %v611_v55, %v1387_v56 }
 0x313   :  { %v917_v9 = vsel %vm499_vm5, 1.0, %v1057_v24  ;;  %v1442_v12 = vmul.f32 %v916_v1, %v525_v61  ;;  %v1446_v14 = vmul.f32 %v621_v33, %v615_v63  ;;  %v1457_v20 = vmul.f32 %v596_v49, %v1397_v51 }
 0x314   :  { %v944_v16 = vpack.i.bf16 %v917_v9, %v916_v1  ;;  %v1452_v19 = vmul.f32 %v917_v9, %v526_v62  ;;  %v1464_v27 = vmul.f32 %v620_v39, %v614_v15  ;;  %vm573_vm2 = vcmask 785408  }
 0x315   :  { %v474_v23 = vpop.f32.mrf.mxu3 }
 0x316   :  { %v518_v21 = vsub.f32 %v474_v23, %v1382_v52  ;;  %945 = vrot.lane.b32.xlu1 %v944_v16, %s1059_s14  ;;  %v1468_v28 = vpop.f32.mrf.mxu0  ;;  %v1470_v13 = vpop.f32.mrf.mxu1  ;;  %vm485_vm6 = vcmp.ge.f32.partialorder %v474_v23, %v1382_v52  ;;  %vm494_vm0 = vcmp.lt.f32.partialorder %v474_v23, %v491_v58  ;;  %v542_v29 = vsub.f32 %v539_v3, %v474_v23 }
 0x317   :  { %v1477_v30 = vsub.f32 %v1468_v28, %v1363_v35  ;;  %v1481_v31 = vsub.f32 %v1470_v13, %v1366_v43  ;;  %vm486_vm7 = vcmp.ge.f32.partialorder %v1468_v28, %v1363_v35  ;;  %vm495_vm8 = vcmp.lt.f32.partialorder %v1468_v28, %v489_v5  ;;  %vm500_vm9 = vmand %vm485_vm6, %vm494_vm0 }
 0x318   :  { %vm501_vm10 = vmand %vm486_vm7, %vm495_vm8  ;;  %v918_v34 = vsel %vm500_vm9, 1.0, %v1057_v24  ;;  %vm487_vm11 = vcmp.ge.f32.partialorder %v1470_v13, %v1366_v43  ;;  %vm496_vm12 = vcmp.lt.f32.partialorder %v1470_v13, %v490_v45  ;;  %v551_v37 = vmul.f32 %v548_v18, %v542_v29 }
 0x319   :  { %v919_v38 = vsel %vm501_vm10, 1.0, %v1057_v24  ;;  %vm502_vm13 = vmand %vm487_vm11, %vm496_vm12  ;;  %v527_v11 = vmul.f32 %v524_v25, %v518_v21  ;;  %v529_v40 = vmul.f32 %v523_v36, %v1481_v31  ;;  %v528_v22 = vmul.f32 %v522_v50, %v1477_v30 }
 0x31a   :  { %v949_v2 = vpack.i.bf16 %v919_v38, %v918_v34  ;;  %v920_v41 = vsel %vm502_vm13, 1.0, %v1057_v24  ;;  %v601_v43 = vmul.f32 %v598_v10, %v518_v21  ;;  %v622_v5 = vperm.slane %v1371_v44, 6 }
 0x31b   :  { %v533_v42 = vmul.f32 %v918_v34, %v527_v11  ;;  %v535_v35 = vmul.f32 %v920_v41, %v529_v40  ;;  %v534_v45 = vmul.f32 %v919_v38, %v528_v22  ;;  %v616_v6 = vsub.f32 %v613_v26, %v474_v23 }
 0x31c   :  { %950 = vrot.lane.b32.xlu2 %v949_v2, %s1059_s14  ;;  %v603_v36 = vmul.f32 %v597_v54, %v1481_v31  ;;  %v602_v61 = vmul.f32 %v596_v49, %v1477_v30 }
 0x31d   :  { %v477_v60 = vpop.f32.mrf.mxu3  ;;  %v625_v63 = vmul.f32 %v622_v5, %v616_v6 }
 0x31e   :  { %v521_v50 = vsub.f32 %v477_v60, %v1382_v52  ;;  %vm488_vm14 = vcmp.ge.f32.partialorder %v477_v60, %v1382_v52  ;;  %vm497_vm15 = vcmp.lt.f32.partialorder %v477_v60, %v491_v58  ;;  %v545_v62 = vsub.f32 %v539_v3, %v477_v60 }
 0x31f   :  { %vm503_vm1 = vmand %vm488_vm14, %vm497_vm15  ;;  %v619_v1 = vsub.f32 %v613_v26, %v477_v60 }
 0x320   :  { %v921_v9 = vsel %vm503_vm1, 1.0, %v1057_v24  ;;  %v554_v15 = vmul.f32 %v548_v18, %v545_v62  ;;  %v530_v16 = vmul.f32 %v524_v25, %v521_v50  ;;  %v604_v54 = vmul.f32 %v598_v10, %v521_v50 }
 0x321   :  { %v954_v23 = vpack.i.bf16 %v921_v9, %v920_v41  ;;  %v1513_v21 = vmul.f32 %v622_v5, %v619_v1  ;;  %v544_v41 = vsub.f32 %v538_v48, %v1470_v13 }
 0x322   :  { %v536_v49 = vmul.f32 %v921_v9, %v530_v16 }
 0x323   :  { %955 = vrot.lane.b32.xlu0 %v954_v23, %s1059_s14 }
 0x376   :  { %v951_v29 = vpop.permute.xlu2 %950 }
 0x377   :  { %v952_v52 = vunpack.i.l.bf16 %v951_v29 }
 0x379   :  { %v586_v34 = vmul.f32 %v952_v52, %v551_v37 }
 0x37b   :  { %v592_v44 = vadd.f32 %v586_v34, %v533_v42  ;;  %v553_v42 = vmul.f32 %v547_v53, %v544_v41 }
 0x37d   :  { %639 = vrot.lane.b32.xlu0 %v592_v44, %s1059_s14  ;;  %v607_v58 = vmul.f32 %v601_v43, %v592_v44 }
 0x388   :  { %v946_v3 = vpop.permute.xlu1 %945 }
 0x389   :  { %v948_v26 = vunpack.i.h.bf16 %v946_v3  ;;  %v947_v24 = vunpack.i.l.bf16 %v946_v3 }
 0x38b   :  { %v574_v18 = vsel %vm573_vm2, %v947_v24, %v948_v26  ;;  %v575_v25 = vsel %vm573_vm2, %v948_v26, %v952_v52  ;;  %v795_v52 = vld [vmem:[#allocation5 + $0xf0] sm:$0xff]  ;;  %v618_v24 = vsub.f32 %v612_v47, %v1470_v13 }
 0x38c   :  { %v584_v10 = vmul.f32 %v574_v18, %v1435_v4  ;;  %v585_v38 = vmul.f32 %v575_v25, %v1439_v8  ;;  %v543_v4 = vsub.f32 %v537_v46, %v1468_v28  ;;  %v617_v18 = vsub.f32 %v611_v55, %v1468_v28 }
 0x38e   :  { %v590_v11 = vadd.f32 %v584_v10, %v1442_v12  ;;  %v591_v37 = vadd.f32 %v585_v38, %v1452_v19  ;;  %v953_v12 = vunpack.i.h.bf16 %v951_v29  ;;  %v627_v10 = vmul.f32 %v621_v33, %v618_v24 }
 0x390   :  { %635 = vrot.lane.b32.xlu1 %v590_v11, %s1059_s14  ;;  %637 = vrot.lane.b32.xlu2 %v591_v37, %s1059_s14  ;;  %v606_v40 = vmul.f32 %v1429_v0, %v591_v37  ;;  %v605_v2 = vmul.f32 %v1457_v20, %v590_v11  ;;  %v552_v0 = vmul.f32 %v546_v32, %v543_v4  ;;  %v1545_v32 = vld [vmem:[%s1616_s5 + $0x20] sm:$0x7] }
 0x391   :  { %v670_v16 = vperm.slane %v1545_v32, 0  ;;  %v626_v11 = vmul.f32 %v620_v39, %v617_v18  ;;  %v794_v39 = vld [vmem:[#allocation5 + $0xe8] sm:$0xff] }
 0x393   :  { %v672_v29 = vmul.f32 %v670_v16, %v1401_v59  ;;  %v674_v55 = vmul.f32 %v670_v16, %v1481_v31  ;;  %v779_v31 = vld [vmem:[#allocation5 + $0x70] sm:$0xff]  ;;  %v772_v16 = vld [vmem:[#allocation5 + $0x38] sm:$0xff] }
 0x395   :  { %v956_v8 = vpop.permute.xlu0 %955 }
 0x396   :  { %v958_v22 = vunpack.i.h.bf16 %v956_v8  ;;  %v957_v19 = vunpack.i.l.bf16 %v956_v8  ;;  %v793_v8 = vld [vmem:[#allocation5 + $0xe0] sm:$0xff] }
 0x398   :  { %v589_v43 = vmul.f32 %v958_v22, %v554_v15  ;;  %v576_v20 = vsel %vm573_vm2, %v953_v12, %v957_v19  ;;  %v577_v5 = vsel %vm573_vm2, %v957_v19, %v958_v22  ;;  %v792_v12 = vld [vmem:[#allocation5 + $0xd8] sm:$0xff]  ;;  %v791_v19 = vld [vmem:[#allocation5 + $0xd0] sm:$0xff] }
 0x399   :  { %v588_v48 = vmul.f32 %v577_v5, %v553_v42  ;;  %v587_v6 = vmul.f32 %v576_v20, %v552_v0  ;;  %v780_v22 = vld [vmem:[#allocation5 + $0x78] sm:$0xff]  ;;  %v778_v42 = vld [vmem:[#allocation5 + $0x68] sm:$0xff]  ;;  %v777_v0 = vld [vmem:[#allocation5 + $0x60] sm:$0xff] }
 0x39a   :  { %v595_v60 = vadd.f32 %v589_v43, %v536_v49  ;;  %807 = vmatpush.msrb.mxu0 %v780_v22  ;;  %v789_v43 = vld [vmem:[#allocation5 + $0xc0] sm:$0xff]  ;;  %v788_v20 = vld [vmem:[#allocation5 + $0xb8] sm:$0xff]  ;;  %v787_v5 = vld [vmem:[#allocation5 + $0xb0] sm:$0xff] }
 0x39b   :  { %v594_v50 = vadd.f32 %v588_v48, %v535_v35  ;;  %v593_v46 = vadd.f32 %v587_v6, %v534_v45  ;;  %v786_v48 = vld [vmem:[#allocation5 + $0xa8] sm:$0xff]  ;;  %v785_v6 = vld [vmem:[#allocation5 + $0xa0] sm:$0xff] }
 0x39c   :  { %645 = vrot.lane.b32.xlu0 %v595_v60, %s1059_s14  ;;  %v610_v62 = vmul.f32 %v604_v54, %v595_v60  ;;  %808 = vmatpush.msrb.mxu0 %v779_v31  ;;  %v784_v60 = vld [vmem:[#allocation5 + $0x98] sm:$0xff] }
 0x39d   :  { %643 = vrot.lane.b32.xlu2 %v594_v50, %s1059_s14  ;;  %641 = vrot.lane.b32.xlu1 %v593_v46, %s1059_s14  ;;  %v609_v53 = vmul.f32 %v603_v36, %v594_v50  ;;  %v608_v1 = vmul.f32 %v602_v61, %v593_v46  ;;  %v796_v61 = vld [vmem:[#allocation5 + $0xf8] sm:$0xff]  ;;  %v783_v46 = vld [vmem:[#allocation5 + $0x90] sm:$0xff] }
 0x39e   :  { %830 = vmatpush.msra.mxu1 %v796_v61  ;;  %809 = vmatpush.msrb.mxu0 %v778_v42  ;;  %v776_v50 = vld [vmem:[#allocation5 + $0x58] sm:$0xff]  ;;  %v680_v61 = vperm.slane %v1545_v32, 2 }
 0x3a0   :  { %831 = vmatpush.msra.mxu1 %v795_v52  ;;  %810 = vmatpush.msrb.mxu0 %v777_v0  ;;  %v765_v52 = vld [vmem:[#allocation5] sm:$0xff] }
 0x3a2   :  { %832 = vmatpush.msra.mxu1 %v794_v39  ;;  %811 = vmatpush.msrb.mxu0 %v776_v50 }
 0x3a4   :  { %833 = vmatpush.msra.mxu1 %v793_v8  ;;  %v870_v8 = vpop.f32.mrf.mxu3 }
 0x3a6   :  { %834 = vmatpush.msra.mxu1 %v792_v12 }
 0x3a8   :  { %835 = vmatpush.msra.mxu1 %v791_v19 }
 0x3ea   :  { %v638_v9 = vpop.permute.xlu2 %637 }
 0x3ef   :  { %v640_v15 = vpop.permute.xlu0 %639 }
 0x3f0   :  { %v648_v35 = vsel %vm573_vm2, %v638_v9, %v640_v15  ;;  %v659_v45 = vmul.f32 %v640_v15, %v625_v63  ;;  %v1558_v63 = vld [vmem:[%s1616_s5 + $0x18] sm:$0x7]  ;;  %v773_v15 = vld [vmem:[#allocation5 + $0x40] sm:$0xff]  ;;  %s1060_s5 = smov [#allocation7]  }
 0x3f1   :  { %v658_v54 = vmul.f32 %v648_v35, %v1446_v14  ;;  %v669_v34 = vperm.slane %v1558_v63, 0  ;;  %v771_v35 = vld [vmem:[#allocation5 + $0x30] sm:$0xff]  ;;  %s882_s19 = sshll.u32 %s1060_s5, 4  ;;  %s883_s19 = int_to_ptr.vmem [resolvable:$true] %s882_s19 }
 0x3f2   :  { %v665_v23 = vadd.f32 %v659_v45, %v607_v58  ;;  %v770_v45 = vld [vmem:[#allocation5 + $0x28] sm:$0xff] }
 0x3f3   :  { %v664_v49 = vadd.f32 %v658_v54, %v606_v40  ;;  %v671_v3 = vmul.f32 %v669_v34, %v1397_v51  ;;  %v673_v33 = vmul.f32 %v669_v34, %v1477_v30  ;;  %v790_v30 = vld [vmem:[#allocation5 + $0xc8] sm:$0xff]  ;;  %v769_v54 = vld [vmem:[#allocation5 + $0x20] sm:$0xff]  ;;  %v686_v34 = vperm.slane %v1545_v32, 1 }
 0x3f4   :  { %701 = vrot.lane.b32.xlu0 %v665_v23, %s1059_s14  ;;  %836 = vmatpush.msra.mxu1 %v790_v30  ;;  %v768_v23 = vld [vmem:[#allocation5 + $0x18] sm:$0xff] }
 0x3f5   :  { %699 = vrot.lane.b32.xlu2 %v664_v49, %s1059_s14  ;;  %v1553_v36 = vmul.f32 %v672_v29, %v664_v49  ;;  %v767_v49 = vld [vmem:[#allocation5 + $0x10] sm:$0xff]  ;;  %v766_v29 = vld [vmem:[#allocation5 + $0x8] sm:$0xff] }
 0x3f6   :  { %837 = vmatpush.msra.mxu1 %v789_v43 }
 0x3f7   :  { %v644_v25 = vpop.permute.xlu2 %643 }
 0x3f8   :  { %838 = vmatpush.msra.mxu1 %v788_v20 }
 0x3fa   :  { %839 = vmatpush.msra.mxu1 %v787_v5 }
 0x3fc   :  { %840 = vmatpush.msra.mxu1 %v786_v48 }
 0x3fe   :  { %841 = vmatpush.msra.mxu1 %v785_v6 }
 0x400   :  { %842 = vmatpush.msra.mxu1 %v784_v60 }
 0x402   :  { %v636_v14 = vpop.permute.xlu1 %635  ;;  %843 = vmatpush.msra.mxu1 %v783_v46 }
 0x403   :  { %v647_v59 = vsel %vm573_vm2, %v636_v14, %v638_v9  ;;  %v781_v9 = vld [vmem:[#allocation5 + $0x80] sm:$0xff]  ;;  %v682_v14 = vsub.f32 %v680_v61, %v1389_v57 }
 0x404   :  { %v657_v44 = vmul.f32 %v647_v59, %v1464_v27 }
 0x406   :  { %v663_v58 = vadd.f32 %v657_v44, %v605_v2  ;;  %v688_v44 = vmul.f32 %v686_v34, %v682_v14 }
 0x408   :  { %697 = vrot.lane.b32.xlu1 %v663_v58, %s1059_s14  ;;  %v1565_v26 = vmul.f32 %v671_v3, %v663_v58 }
 0x40e   :  { %v646_v27 = vpop.permute.xlu0 %645 }
 0x40f   :  { %v650_v38 = vsel %vm573_vm2, %v644_v25, %v646_v27  ;;  %v662_v51 = vmul.f32 %v646_v27, %v1513_v21  ;;  %v642_v37 = vpop.permute.xlu1 %641  ;;  %v685_v27 = vperm.slane %v1558_v63, 1 }
 0x410   :  { %v661_v40 = vmul.f32 %v650_v38, %v627_v10  ;;  %v649_v47 = vsel %vm573_vm2, %v642_v37, %v644_v25  ;;  %v679_v25 = vperm.slane %v1558_v63, 2  ;;  %v684_v37 = vsub.f32 %v680_v61, %v1470_v13 }
 0x411   :  { %v668_v2 = vadd.f32 %v662_v51, %v610_v62  ;;  %v660_v41 = vmul.f32 %v649_v47, %v626_v11  ;;  %v775_v62 = vld [vmem:[#allocation5 + $0x50] sm:$0xff] }
 0x412   :  { %v667_v4 = vadd.f32 %v661_v40, %v609_v53  ;;  %v782_v53 = vld [vmem:[#allocation5 + $0x88] sm:$0xff]  ;;  %812 = vmatpush.msrb.mxu0 %v775_v62  ;;  %v681_v10 = vsub.f32 %v679_v25, %v1387_v56  ;;  %v683_v40 = vsub.f32 %v679_v25, %v1468_v28  ;;  %v690_v47 = vmul.f32 %v686_v34, %v684_v37 }
 0x413   :  { %707 = vrot.lane.b32.xlu0 %v668_v2, %s1059_s14  ;;  %v666_v17 = vadd.f32 %v660_v41, %v608_v1  ;;  %v774_v1 = vld [vmem:[#allocation5 + $0x48] sm:$0xff]  ;;  %844 = vmatpush.msra.mxu1 %v782_v53 }
 0x414   :  { %705 = vrot.lane.b32.xlu2 %v667_v4, %s1059_s14  ;;  %v1584_v21 = vmul.f32 %v674_v55, %v667_v4  ;;  %813 = vmatpush.msrb.mxu0 %v774_v1  ;;  %v687_v38 = vmul.f32 %v685_v27, %v681_v10  ;;  %v689_v4 = vmul.f32 %v685_v27, %v683_v40 }
 0x415   :  { %703 = vrot.lane.b32.xlu1 %v666_v17, %s1059_s14  ;;  %v1587_v7 = vmul.f32 %v673_v33, %v666_v17  ;;  %845 = vmatpush.msra.mxu1 %v781_v9 }
 0x416   :  { %814 = vmatpush.msrb.mxu0 %v773_v15 }
 0x418   :  { %815 = vmatpush.msrb.mxu0 %v772_v16 }
 0x41a   :  { %816 = vmatpush.msrb.mxu0 %v771_v35 }
 0x41c   :  { %817 = vmatpush.msrb.mxu0 %v770_v45 }
 0x41e   :  { %818 = vmatpush.msrb.mxu0 %v769_v54 }
 0x420   :  { %819 = vmatpush.msrb.mxu0 %v768_v23 }
 0x422   :  { %820 = vmatpush.msrb.mxu0 %v767_v49 }
 0x424   :  { %821 = vmatpush.msrb.mxu0 %v766_v29 }
 0x426   :  { %822 = vmatpush.msrb.mxu0 %v765_v52 }
 0x44f   :  { %v700_v59 = vpop.permute.xlu2 %699 }
 0x466   :  { %v702_v58 = vpop.permute.xlu0 %701 }
 0x467   :  { %v710_v3 = vsel %vm573_vm2, %v700_v59, %v702_v58 }
 0x468   :  { %v718_v24 = vmul.f32 %v710_v3, %v688_v44 }
 0x46a   :  { %v722_v18 = vadd.f32 %v718_v24, %v1553_v36 }
 0x46c   :  { %846 = vmatmul.f32.vlgmr.msra.gmra.mxu1 %v722_v18 }
 0x46e   :  { %v706_v36 = vpop.permute.xlu2 %705 }
 0x47a   :  { %v698_v51 = vpop.permute.xlu1 %697 }
 0x47b   :  { %v709_v57 = vsel %vm573_vm2, %v698_v51, %v700_v59 }
 0x47c   :  { %v717_v32 = vmul.f32 %v709_v57, %v687_v38 }
 0x47e   :  { %v721_v11 = vadd.f32 %v717_v32, %v1565_v26 }
 0x480   :  { %823 = vmatmul.f32.vlgmr.msrb.gmra.mxu0 %v721_v11 }
 0x485   :  { %v708_v2 = vpop.permute.xlu0 %707 }
 0x486   :  { %v712_v41 = vsel %vm573_vm2, %v706_v36, %v708_v2 }
 0x487   :  { %v720_v56 = vmul.f32 %v712_v41, %v690_v47  ;;  %v704_v63 = vpop.permute.xlu1 %703 }
 0x488   :  { %v711_v55 = vsel %vm573_vm2, %v704_v63, %v706_v36 }
 0x489   :  { %v719_v17 = vmul.f32 %v711_v55, %v689_v4  ;;  %v724_v33 = vadd.f32 %v720_v56, %v1584_v21  ;;  %v873_v21 = vpop.f32.mrf.mxu3 }
 0x48b   :  { %849 = vmatmul.f32.gmra.mxu1 %v724_v33  ;;  %v723_v26 = vadd.f32 %v719_v17, %v1587_v7 }
 0x48d   :  { %826 = vmatmul.f32.gmra.mxu0 %v723_v26 }
 0x4e9   :  { %v847_v13 = vpop.f32.mrf.mxu1 }
 0x4fd   :  { %v824_v39 = vpop.f32.mrf.mxu0 }
 0x4fe   :  { %v848_v28 = vadd.f32 %v847_v13, %v824_v39 }
 0x500   :  { %v871_v12 = vadd.f32 %v870_v8, %v848_v28 }
 0x502   :  { %876 = vst [vmem:[#allocation7] sm:$0xff] %v871_v12 }
 0x508   :  { %v850_v22 = vpop.f32.mrf.mxu1 }
 0x50a   :  { %v827_v31 = vpop.f32.mrf.mxu0 }
 0x50b   :  { %v851_v19 = vadd.f32 %v850_v22, %v827_v31 }
 0x50d   :  { %v874_v42 = vadd.f32 %v873_v21, %v851_v19 }
 0x50f   :  { %877 = vst [vmem:[#allocation7 + $0x8] sm:$0xff] %v874_v42 }
 0x510   :  { %890 = dma.vmem_to_hbm [thread:$0]  %s883_s19, 256, %s885_s21, [#allocation4], %s1054_s9, %s1054_s9, %s1055_s10  }
 0x511   :  { %1051 = dma.done.wait [#allocation4], 256  }
 0x512   :  { %1052 = vsyncadd [#allocation4], 4294967040 }
 0x513   :  { %895 = vsyncpa [#allocation3], 1 }
 0x514   :  { %896 = vsyncpa [#allocation6], 1 }
 0x515   :  { %897 = vsyncpa [#allocation4], 1 }

</bundles_post_ra>
